<compile_context>
chip_gen: v7x
topology: tpu7x:2x2x1
jax: 0.10.0
libtpu: 0.0.40
codegen_flags: <defaults>
</compile_context>

<pallas_src>
import functools

import jax
import jax.numpy as jnp
from jax.experimental import pallas as pl
from jax.experimental.pallas import tpu as pltpu


# ----------------------------------------------------------------------------
# Kernel: grid = (batch_tiles, layers).  The output block (same index across
# the layer axis) is the VMEM-resident running activation.
# ----------------------------------------------------------------------------
def _bottleneck_kernel(x_ref, w_ref, b_ref, out_ref, abig_ref, *,
                       H, W, K, padding, margin, TB, C):
    # x_ref   : (TB*C, HW)          batch-tile; (batch, channel) on sublanes
    # w_ref   : (1, K*K*C, C)       CURRENT layer's weights, rows = (tap, cout)
    # b_ref   : (1, C, 1)           current layer's bias (f32)
    # out_ref : (TB*C, HW)          running activation, resident across layers
    # abig_ref: (TB*C, HW+2*margin) zero-margined flat leaky_relu buffer
    HW = H * W
    d = pl.program_id(1)

    @pl.when(d == 0)
    def _():
        # Init the running activation with x and zero only the two margin
        # strips (the interior is rewritten every layer).
        out_ref[...] = x_ref[...]
        zeros = jnp.zeros((TB * C, margin), jnp.float32)
        abig_ref[:, pl.ds(0, margin)] = zeros
        abig_ref[:, pl.ds(margin + HW, margin)] = zeros

    # Column-validity masks, one per horizontal tap offset dx (hoisted out of
    # the tap loops).  The vertical (dy) checks are redundant: vertical
    # out-of-image taps land in the zeroed lane margins of abig_ref.
    hw_idx = jax.lax.broadcasted_iota(jnp.int32, (1, HW), 1)
    col = hw_idx % W
    col_mask = [(col + dx >= 0) & (col + dx < W)
                for dx in range(-padding, padding + 1)]

    w_layer = w_ref[0]                  # (K*K*C, C); w_layer[t*C+co, ci]
    b_layer = b_ref[0]                  # (C, 1), stays f32
    mxu_dtype = w_layer.dtype           # f32 or bf16 (operand-only cast)

    # leaky_relu of the whole batch-tile: one full-sublane, lane-aligned store
    # into the interior of the padded flat buffer.
    act = out_ref[...]                  # x_d (f32)
    abig_ref[:, pl.ds(margin, HW)] = jnp.where(
        act > 0, act, jnp.float32(0.01) * act)

    # Per batch element: residual + bias folded into the accumulator init,
    # then K*K accumulated (C, C) @ (C, HW) matmuls (no im2col buffer).
    for b in range(TB):                 # TB is small and static
        rows = pl.ds(b * C, C)
        acc = act[b * C:(b + 1) * C, :] + b_layer          # (C, HW), f32
        for ki in range(K):
            dy = ki - padding
            for kj in range(K):
                dx = kj - padding
                t = ki * K + kj
                shift = dy * W + dx
                # Shifted view of leaky_relu(x_d); out-of-image columns masked
                # (rows are handled by the zero margins).
                src = abig_ref[rows, pl.ds(margin + shift, HW)]     # (C, HW)
                src = jnp.where(col_mask[kj], src, 0.0).astype(mxu_dtype)
                w_tap = w_layer[t * C:(t + 1) * C, :]               # (C, C)
                acc = acc + jnp.dot(w_tap, src,
                                    preferred_element_type=jnp.float32)
        out_ref[rows, :] = acc.astype(out_ref.dtype)


# ----------------------------------------------------------------------------
# Bottleneck forward.  Accepts NCHW input (PyTorch convention), returns NCHW.
# params: list of (w_hwio (K,K,Cin,Cout), bias (Cout,)) per layer.
# ----------------------------------------------------------------------------
def bottleneck_forward(x_nchw, params, padding, *,
                       matmul_dtype=jnp.float32, batch_tile=None):
    N, C, H, W = x_nchw.shape
    K = params[0][0].shape[0]
    D = len(params)
    HW = H * W
    # Residual add requires the conv to preserve the spatial size.
    assert 2 * padding == K - 1, "padding must preserve H, W"
    # Lane-dense stores / aligned interior writes require HW % 128 == 0.
    assert HW % 128 == 0, "H*W must be a multiple of 128 (pad spatially first)"

    # Batch tile: smallest divisor of N that fills the 8-row sublane quantum.
    if batch_tile is None:
        batch_tile = N
        for t in range(1, N + 1):
            if N % t == 0 and (t * C) % 8 == 0:
                batch_tile = t
                break
    assert N % batch_tile == 0
    TB = batch_tile

    # Per-layer, per-tap weights: w_stack[d, t*C + co, ci] with t = ki*K + kj.
    # params hold HWIO (K, K, Cin, Cout).
    w_stack = jnp.stack([
        jnp.transpose(w.reshape(K * K, C, C), (0, 2, 1)).reshape(K * K * C, C)
        for (w, _) in params
    ]).astype(matmul_dtype)                                    # (D, K*K*C, C)
    b_stack = jnp.stack([b for (_, b) in params]).reshape(D, C, 1)   # f32

    # Merge (batch, channel) onto sublanes, spatial onto lanes. Contiguous
    # reshape: no relayout, layout stays NCHW-derived.
    x2 = x_nchw.reshape(N * C, HW)

    # Flat-buffer margin: >= padding*W + padding, rounded to 128 so the
    # interior store is lane-aligned.
    margin = ((padding * W + padding + 127) // 128) * 128

    out = pl.pallas_call(
        functools.partial(_bottleneck_kernel, H=H, W=W, K=K, padding=padding,
                          margin=margin, TB=TB, C=C),
        out_shape=jax.ShapeDtypeStruct((N * C, HW), x_nchw.dtype),
        grid=(N // TB, D),
        in_specs=[
            pl.BlockSpec((TB * C, HW), lambda i, d: (i, 0)),
            pl.BlockSpec((1, K * K * C, C), lambda i, d: (d, 0, 0)),   # streamed per layer
            pl.BlockSpec((1, C, 1), lambda i, d: (d, 0, 0)),
        ],
        out_specs=pl.BlockSpec((TB * C, HW), lambda i, d: (i, 0)),
        scratch_shapes=[
            pltpu.VMEM((TB * C, HW + 2 * margin), jnp.float32),  # padded flat act
        ],
        compiler_params=pltpu.CompilerParams(
            dimension_semantics=("parallel", "arbitrary"),
            vmem_limit_bytes=48 * 1024 * 1024),
    )(x2, w_stack, b_stack)

    return out.reshape(N, C, H, W)


# ----------------------------------------------------------------------------
# Deterministic parameter init (shapes match nn.Conv2d(width, width, K, pad)).
# ----------------------------------------------------------------------------
def init_params(key, width, block_depth, kernel_size):
    params = []
    fan_in = width * kernel_size * kernel_size
    bound = 1.0 / jnp.sqrt(jnp.float32(fan_in))
    for d in range(block_depth):
        kw, kb = jax.random.split(jax.random.fold_in(key, d))
        # HWIO layout: (K, K, Cin, Cout)
        w = jax.random.uniform(kw, (kernel_size, kernel_size, width, width),
                               jnp.float32, -bound, bound)
        b = jax.random.uniform(kb, (width,), jnp.float32, -bound, bound)
        params.append((w, b))
    return params


# ----------------------------------------------------------------------------
# Pure-JAX reference (correctness check only).
# ----------------------------------------------------------------------------
def bottleneck_ref(x_nchw, params, padding):
    x = jnp.transpose(x_nchw, (0, 2, 3, 1))
    for (w_hwio, b) in params:
        a = jax.nn.leaky_relu(x, negative_slope=0.01)
        conv = jax.lax.conv_general_dilated(
            a, w_hwio, window_strides=(1, 1),
            padding=[(padding, padding), (padding, padding)],
            dimension_numbers=("NHWC", "HWIO", "NHWC"))
        x = x + conv + b
    return jnp.transpose(x, (0, 3, 1, 2))


if __name__ == "__main__":
    width = 4
    block_depth = 2
    block_kernel = 3
    block_padding = 1

    key = jax.random.PRNGKey(0)
    kx, kp = jax.random.split(key)
    x = jax.random.normal(kx, (2, width, 16, 16), jnp.float32)   # NCHW
    params = init_params(kp, width, block_depth, block_kernel)

    ref = bottleneck_ref(x, params, block_padding)

    # f32 MXU operands: tight match vs. the f32 reference.
    out = jax.block_until_ready(bottleneck_forward(x, params, block_padding))
    assert out.shape == ref.shape == x.shape
    assert jnp.allclose(out, ref, atol=1e-4, rtol=1e-4), "f32 mismatch vs reference"

    # bf16 MXU operands (the v6e/v7x fast path): f32 accumulate / bias /
    # residual chain, so only conv operand rounding differs.
    out_bf16 = jax.block_until_ready(
        bottleneck_forward(x, params, block_padding, matmul_dtype=jnp.bfloat16))
    assert jnp.allclose(out_bf16, ref, atol=5e-2, rtol=5e-2), "bf16 mismatch vs reference"

    print("KERNEL_OK")
</pallas_src>

<mosaic_0001>
module attributes {stable_mosaic.version = 11 : i64} {
  func.func @_bottleneck_kernel(%arg0: i32, %arg1: i32, %arg2: memref<8x256xf32, #tpu.memory_space<vmem>>, %arg3: memref<1x36x4xf32, #tpu.memory_space<vmem>>, %arg4: memref<1x4x1xf32, #tpu.memory_space<vmem>>, %arg5: memref<8x256xf32, #tpu.memory_space<vmem>>, %arg6: memref<8x512xf32, #tpu.memory_space<vmem>>) attributes {dimension_semantics = [#tpu.dimension_semantics<parallel>, #tpu.dimension_semantics<arbitrary>], iteration_bounds = array<i64: 1, 2>, scalar_prefetch = 0 : i64, scratch_operands = 1 : i64, tpu.core_type = #tpu.core_type<tc>, window_params = [{transform_indices = @transform_0, window_bounds = array<i64: 8, 256>}, {transform_indices = @transform_1, window_bounds = array<i64: 1, 36, 4>}, {transform_indices = @transform_2, window_bounds = array<i64: 1, 4, 1>}, {transform_indices = @transform_3, window_bounds = array<i64: 8, 256>}]} {
    %c0_i32 = arith.constant 0 : i32
    %0 = arith.cmpi eq, %arg1, %c0_i32 : i32
    %1 = arith.extui %0 : i1 to i32
    %c0_i32_0 = arith.constant 0 : i32
    %2 = arith.cmpi ne, %1, %c0_i32_0 : i32
    scf.if %2 {
      %c0_92 = arith.constant 0 : index
      %c0_93 = arith.constant 0 : index
      %210 = vector.load %arg2[%c0_92, %c0_93] : memref<8x256xf32, #tpu.memory_space<vmem>>, vector<8x256xf32>
      %c0_94 = arith.constant 0 : index
      %c0_95 = arith.constant 0 : index
      %211 = vector.load %arg5[%c0_94, %c0_95] : memref<8x256xf32, #tpu.memory_space<vmem>>, vector<8x256xf32>
      tpu.vector_store %arg5[%c0_94, %c0_95], %210 {strides = array<i32>} : memref<8x256xf32, #tpu.memory_space<vmem>>, vector<8x256xf32>,
      %cst_96 = arith.constant 0.000000e+00 : f32
      %212 = vector.broadcast %cst_96 : f32 to vector<8x128xf32>
      %c0_97 = arith.constant 0 : index
      %c0_98 = arith.constant 0 : index
      %213 = vector.load %arg6[%c0_97, %c0_98] : memref<8x512xf32, #tpu.memory_space<vmem>>, vector<8x128xf32>
      tpu.vector_store %arg6[%c0_97, %c0_98], %212 {strides = array<i32>} : memref<8x512xf32, #tpu.memory_space<vmem>>, vector<8x128xf32>,
      %c0_99 = arith.constant 0 : index
      %c384 = arith.constant 384 : index
      %214 = vector.load %arg6[%c0_99, %c384] : memref<8x512xf32, #tpu.memory_space<vmem>>, vector<8x128xf32>
      tpu.vector_store %arg6[%c0_99, %c384], %212 {strides = array<i32>} : memref<8x512xf32, #tpu.memory_space<vmem>>, vector<8x128xf32>,
    } else {
    }
    %3 = tpu.iota {dimensions = array<i32: 1>} : vector<1x256xi32>
    %c16_i32 = arith.constant 16 : i32
    %c0_i32_1 = arith.constant 0 : i32
    %4 = arith.cmpi eq, %c16_i32, %c0_i32_1 : i32
    %c1_i32 = arith.constant 1 : i32
    %5 = arith.select %4, %c1_i32, %c16_i32 : i32
    %6 = vector.broadcast %5 : i32 to vector<1x256xi32>
    %7 = arith.remsi %3, %6 : vector<1x256xi32>
    %c0_i32_2 = arith.constant 0 : i32
    %8 = vector.broadcast %c0_i32_2 : i32 to vector<1x256xi32>
    %9 = arith.cmpi ne, %7, %8 : vector<1x256xi32>
    %c0_i32_3 = arith.constant 0 : i32
    %10 = vector.broadcast %c0_i32_3 : i32 to vector<1x256xi32>
    %11 = arith.cmpi slt, %7, %10 : vector<1x256xi32>
    %c0_i32_4 = arith.constant 0 : i32
    %12 = arith.cmpi slt, %5, %c0_i32_4 : i32
    %13 = vector.broadcast %12 : i1 to vector<1x256xi1>
    %14 = vector.broadcast %13 : vector<1x256xi1> to vector<1x256xi1>
    %15 = arith.xori %11, %14 : vector<1x256xi1>
    %16 = arith.andi %15, %9 : vector<1x256xi1>
    %17 = vector.broadcast %5 : i32 to vector<1x256xi32>
    %18 = arith.addi %7, %17 : vector<1x256xi32>
    %19 = arith.select %16, %18, %7 : vector<1x256xi1>, vector<1x256xi32>
    %c-1_i32 = arith.constant -1 : i32
    %20 = vector.broadcast %c-1_i32 : i32 to vector<1x256xi32>
    %21 = arith.addi %19, %20 : vector<1x256xi32>
    %c0_i32_5 = arith.constant 0 : i32
    %22 = vector.broadcast %c0_i32_5 : i32 to vector<1x256xi32>
    %23 = arith.cmpi sge, %21, %22 : vector<1x256xi32>
    %c-1_i32_6 = arith.constant -1 : i32
    %24 = vector.broadcast %c-1_i32_6 : i32 to vector<1x256xi32>
    %25 = arith.addi %19, %24 : vector<1x256xi32>
    %c16_i32_7 = arith.constant 16 : i32
    %26 = vector.broadcast %c16_i32_7 : i32 to vector<1x256xi32>
    %27 = arith.cmpi slt, %25, %26 : vector<1x256xi32>
    %28 = arith.andi %23, %27 : vector<1x256xi1>
    %c0_i32_8 = arith.constant 0 : i32
    %29 = vector.broadcast %c0_i32_8 : i32 to vector<1x256xi32>
    %30 = arith.addi %19, %29 : vector<1x256xi32>
    %c0_i32_9 = arith.constant 0 : i32
    %31 = vector.broadcast %c0_i32_9 : i32 to vector<1x256xi32>
    %32 = arith.cmpi sge, %30, %31 : vector<1x256xi32>
    %c0_i32_10 = arith.constant 0 : i32
    %33 = vector.broadcast %c0_i32_10 : i32 to vector<1x256xi32>
    %34 = arith.addi %19, %33 : vector<1x256xi32>
    %c16_i32_11 = arith.constant 16 : i32
    %35 = vector.broadcast %c16_i32_11 : i32 to vector<1x256xi32>
    %36 = arith.cmpi slt, %34, %35 : vector<1x256xi32>
    %37 = arith.andi %32, %36 : vector<1x256xi1>
    %c1_i32_12 = arith.constant 1 : i32
    %38 = vector.broadcast %c1_i32_12 : i32 to vector<1x256xi32>
    %39 = arith.addi %19, %38 : vector<1x256xi32>
    %c0_i32_13 = arith.constant 0 : i32
    %40 = vector.broadcast %c0_i32_13 : i32 to vector<1x256xi32>
    %41 = arith.cmpi sge, %39, %40 : vector<1x256xi32>
    %c1_i32_14 = arith.constant 1 : i32
    %42 = vector.broadcast %c1_i32_14 : i32 to vector<1x256xi32>
    %43 = arith.addi %19, %42 : vector<1x256xi32>
    %c16_i32_15 = arith.constant 16 : i32
    %44 = vector.broadcast %c16_i32_15 : i32 to vector<1x256xi32>
    %45 = arith.cmpi slt, %43, %44 : vector<1x256xi32>
    %46 = arith.andi %41, %45 : vector<1x256xi1>
    %c0 = arith.constant 0 : index
    %c0_16 = arith.constant 0 : index
    %c0_17 = arith.constant 0 : index
    %47 = vector.load %arg3[%c0, %c0_16, %c0_17] : memref<1x36x4xf32, #tpu.memory_space<vmem>>, vector<1x36x4xf32>
    %48 = vector.shape_cast %47 : vector<1x36x4xf32> to vector<36x4xf32>
    %c0_18 = arith.constant 0 : index
    %c0_19 = arith.constant 0 : index
    %c0_20 = arith.constant 0 : index
    %49 = vector.load %arg4[%c0_18, %c0_19, %c0_20] : memref<1x4x1xf32, #tpu.memory_space<vmem>>, vector<1x4x1xf32>
    %50 = vector.shape_cast %49 : vector<1x4x1xf32> to vector<4x1xf32>
    %c0_21 = arith.constant 0 : index
    %c0_22 = arith.constant 0 : index
    %51 = vector.load %arg5[%c0_21, %c0_22] : memref<8x256xf32, #tpu.memory_space<vmem>>, vector<8x256xf32>
    %cst = arith.constant 0.000000e+00 : f32
    %52 = vector.broadcast %cst : f32 to vector<8x256xf32>
    %53 = arith.cmpf ogt, %51, %52 : vector<8x256xf32>
    %cst_23 = arith.constant 0.00999999977 : f32
    %54 = vector.broadcast %cst_23 : f32 to vector<8x256xf32>
    %55 = arith.mulf %54, %51 : vector<8x256xf32>
    %56 = arith.select %53, %51, %55 : vector<8x256xi1>, vector<8x256xf32>
    %c0_24 = arith.constant 0 : index
    %c128 = arith.constant 128 : index
    %57 = vector.load %arg6[%c0_24, %c128] : memref<8x512xf32, #tpu.memory_space<vmem>>, vector<8x256xf32>
    tpu.vector_store %arg6[%c0_24, %c128], %56 {strides = array<i32>} : memref<8x512xf32, #tpu.memory_space<vmem>>, vector<8x256xf32>,
    %58 = vector.extract_strided_slice %51 {offsets = [0, 0], sizes = [4, 256], strides = [1, 1]} : vector<8x256xf32> to vector<4x256xf32>
    %59 = vector.broadcast %50 : vector<4x1xf32> to vector<4x256xf32>
    %60 = arith.addf %58, %59 : vector<4x256xf32>
    %c0_25 = arith.constant 0 : index
    %c111 = arith.constant 111 : index
    %61 = vector.load %arg6[%c0_25, %c111] : memref<8x512xf32, #tpu.memory_space<vmem>>, vector<4x256xf32>
    %cst_26 = arith.constant 0.000000e+00 : f32
    %62 = vector.shape_cast %28 : vector<1x256xi1> to vector<1x256xi1>
    %63 = vector.broadcast %62 : vector<1x256xi1> to vector<4x256xi1>
    %64 = vector.broadcast %cst_26 : f32 to vector<4x256xf32>
    %65 = arith.select %63, %61, %64 : vector<4x256xi1>, vector<4x256xf32>
    %66 = vector.extract_strided_slice %48 {offsets = [0, 0], sizes = [4, 4], strides = [1, 1]} : vector<36x4xf32> to vector<4x4xf32>
    %cst_27 = arith.constant dense<0.000000e+00> : vector<4x256xf32>
    %67 = tpu.matmul %66, %65, %cst_27 {dimension_numbers = #tpu.dot_dimension_numbers<[1], [0], [0], [1], [0, 0, 1, 1], [], []>} : vector<4x4xf32>, vector<4x256xf32>, vector<4x256xf32> -> vector<4x256xf32>
    %68 = arith.addf %60, %67 : vector<4x256xf32>
    %c0_28 = arith.constant 0 : index
    %c112 = arith.constant 112 : index
    %69 = vector.load %arg6[%c0_28, %c112] : memref<8x512xf32, #tpu.memory_space<vmem>>, vector<4x256xf32>
    %cst_29 = arith.constant 0.000000e+00 : f32
    %70 = vector.shape_cast %37 : vector<1x256xi1> to vector<1x256xi1>
    %71 = vector.broadcast %70 : vector<1x256xi1> to vector<4x256xi1>
    %72 = vector.broadcast %cst_29 : f32 to vector<4x256xf32>
    %73 = arith.select %71, %69, %72 : vector<4x256xi1>, vector<4x256xf32>
    %74 = vector.extract_strided_slice %48 {offsets = [4, 0], sizes = [4, 4], strides = [1, 1]} : vector<36x4xf32> to vector<4x4xf32>
    %cst_30 = arith.constant dense<0.000000e+00> : vector<4x256xf32>
    %75 = tpu.matmul %74, %73, %cst_30 {dimension_numbers = #tpu.dot_dimension_numbers<[1], [0], [0], [1], [0, 0, 1, 1], [], []>} : vector<4x4xf32>, vector<4x256xf32>, vector<4x256xf32> -> vector<4x256xf32>
    %76 = arith.addf %68, %75 : vector<4x256xf32>
    %c0_31 = arith.constant 0 : index
    %c113 = arith.constant 113 : index
    %77 = vector.load %arg6[%c0_31, %c113] : memref<8x512xf32, #tpu.memory_space<vmem>>, vector<4x256xf32>
    %cst_32 = arith.constant 0.000000e+00 : f32
    %78 = vector.shape_cast %46 : vector<1x256xi1> to vector<1x256xi1>
    %79 = vector.broadcast %78 : vector<1x256xi1> to vector<4x256xi1>
    %80 = vector.broadcast %cst_32 : f32 to vector<4x256xf32>
    %81 = arith.select %79, %77, %80 : vector<4x256xi1>, vector<4x256xf32>
    %82 = vector.extract_strided_slice %48 {offsets = [8, 0], sizes = [4, 4], strides = [1, 1]} : vector<36x4xf32> to vector<4x4xf32>
    %cst_33 = arith.constant dense<0.000000e+00> : vector<4x256xf32>
    %83 = tpu.matmul %82, %81, %cst_33 {dimension_numbers = #tpu.dot_dimension_numbers<[1], [0], [0], [1], [0, 0, 1, 1], [], []>} : vector<4x4xf32>, vector<4x256xf32>, vector<4x256xf32> -> vector<4x256xf32>
    %84 = arith.addf %76, %83 : vector<4x256xf32>
    %c0_34 = arith.constant 0 : index
    %c127 = arith.constant 127 : index
    %85 = vector.load %arg6[%c0_34, %c127] : memref<8x512xf32, #tpu.memory_space<vmem>>, vector<4x256xf32>
    %cst_35 = arith.constant 0.000000e+00 : f32
    %86 = vector.shape_cast %28 : vector<1x256xi1> to vector<1x256xi1>
    %87 = vector.broadcast %86 : vector<1x256xi1> to vector<4x256xi1>
    %88 = vector.broadcast %cst_35 : f32 to vector<4x256xf32>
    %89 = arith.select %87, %85, %88 : vector<4x256xi1>, vector<4x256xf32>
    %90 = vector.extract_strided_slice %48 {offsets = [12, 0], sizes = [4, 4], strides = [1, 1]} : vector<36x4xf32> to vector<4x4xf32>
    %cst_36 = arith.constant dense<0.000000e+00> : vector<4x256xf32>
    %91 = tpu.matmul %90, %89, %cst_36 {dimension_numbers = #tpu.dot_dimension_numbers<[1], [0], [0], [1], [0, 0, 1, 1], [], []>} : vector<4x4xf32>, vector<4x256xf32>, vector<4x256xf32> -> vector<4x256xf32>
    %92 = arith.addf %84, %91 : vector<4x256xf32>
    %c0_37 = arith.constant 0 : index
    %c128_38 = arith.constant 128 : index
    %93 = vector.load %arg6[%c0_37, %c128_38] : memref<8x512xf32, #tpu.memory_space<vmem>>, vector<4x256xf32>
    %cst_39 = arith.constant 0.000000e+00 : f32
    %94 = vector.shape_cast %37 : vector<1x256xi1> to vector<1x256xi1>
    %95 = vector.broadcast %94 : vector<1x256xi1> to vector<4x256xi1>
    %96 = vector.broadcast %cst_39 : f32 to vector<4x256xf32>
    %97 = arith.select %95, %93, %96 : vector<4x256xi1>, vector<4x256xf32>
    %98 = vector.extract_strided_slice %48 {offsets = [16, 0], sizes = [4, 4], strides = [1, 1]} : vector<36x4xf32> to vector<4x4xf32>
    %cst_40 = arith.constant dense<0.000000e+00> : vector<4x256xf32>
    %99 = tpu.matmul %98, %97, %cst_40 {dimension_numbers = #tpu.dot_dimension_numbers<[1], [0], [0], [1], [0, 0, 1, 1], [], []>} : vector<4x4xf32>, vector<4x256xf32>, vector<4x256xf32> -> vector<4x256xf32>
    %100 = arith.addf %92, %99 : vector<4x256xf32>
    %c0_41 = arith.constant 0 : index
    %c129 = arith.constant 129 : index
    %101 = vector.load %arg6[%c0_41, %c129] : memref<8x512xf32, #tpu.memory_space<vmem>>, vector<4x256xf32>
    %cst_42 = arith.constant 0.000000e+00 : f32
    %102 = vector.shape_cast %46 : vector<1x256xi1> to vector<1x256xi1>
    %103 = vector.broadcast %102 : vector<1x256xi1> to vector<4x256xi1>
    %104 = vector.broadcast %cst_42 : f32 to vector<4x256xf32>
    %105 = arith.select %103, %101, %104 : vector<4x256xi1>, vector<4x256xf32>
    %106 = vector.extract_strided_slice %48 {offsets = [20, 0], sizes = [4, 4], strides = [1, 1]} : vector<36x4xf32> to vector<4x4xf32>
    %cst_43 = arith.constant dense<0.000000e+00> : vector<4x256xf32>
    %107 = tpu.matmul %106, %105, %cst_43 {dimension_numbers = #tpu.dot_dimension_numbers<[1], [0], [0], [1], [0, 0, 1, 1], [], []>} : vector<4x4xf32>, vector<4x256xf32>, vector<4x256xf32> -> vector<4x256xf32>
    %108 = arith.addf %100, %107 : vector<4x256xf32>
    %c0_44 = arith.constant 0 : index
    %c143 = arith.constant 143 : index
    %109 = vector.load %arg6[%c0_44, %c143] : memref<8x512xf32, #tpu.memory_space<vmem>>, vector<4x256xf32>
    %cst_45 = arith.constant 0.000000e+00 : f32
    %110 = vector.shape_cast %28 : vector<1x256xi1> to vector<1x256xi1>
    %111 = vector.broadcast %110 : vector<1x256xi1> to vector<4x256xi1>
    %112 = vector.broadcast %cst_45 : f32 to vector<4x256xf32>
    %113 = arith.select %111, %109, %112 : vector<4x256xi1>, vector<4x256xf32>
    %114 = vector.extract_strided_slice %48 {offsets = [24, 0], sizes = [4, 4], strides = [1, 1]} : vector<36x4xf32> to vector<4x4xf32>
    %cst_46 = arith.constant dense<0.000000e+00> : vector<4x256xf32>
    %115 = tpu.matmul %114, %113, %cst_46 {dimension_numbers = #tpu.dot_dimension_numbers<[1], [0], [0], [1], [0, 0, 1, 1], [], []>} : vector<4x4xf32>, vector<4x256xf32>, vector<4x256xf32> -> vector<4x256xf32>
    %116 = arith.addf %108, %115 : vector<4x256xf32>
    %c0_47 = arith.constant 0 : index
    %c144 = arith.constant 144 : index
    %117 = vector.load %arg6[%c0_47, %c144] : memref<8x512xf32, #tpu.memory_space<vmem>>, vector<4x256xf32>
    %cst_48 = arith.constant 0.000000e+00 : f32
    %118 = vector.shape_cast %37 : vector<1x256xi1> to vector<1x256xi1>
    %119 = vector.broadcast %118 : vector<1x256xi1> to vector<4x256xi1>
    %120 = vector.broadcast %cst_48 : f32 to vector<4x256xf32>
    %121 = arith.select %119, %117, %120 : vector<4x256xi1>, vector<4x256xf32>
    %122 = vector.extract_strided_slice %48 {offsets = [28, 0], sizes = [4, 4], strides = [1, 1]} : vector<36x4xf32> to vector<4x4xf32>
    %cst_49 = arith.constant dense<0.000000e+00> : vector<4x256xf32>
    %123 = tpu.matmul %122, %121, %cst_49 {dimension_numbers = #tpu.dot_dimension_numbers<[1], [0], [0], [1], [0, 0, 1, 1], [], []>} : vector<4x4xf32>, vector<4x256xf32>, vector<4x256xf32> -> vector<4x256xf32>
    %124 = arith.addf %116, %123 : vector<4x256xf32>
    %c0_50 = arith.constant 0 : index
    %c145 = arith.constant 145 : index
    %125 = vector.load %arg6[%c0_50, %c145] : memref<8x512xf32, #tpu.memory_space<vmem>>, vector<4x256xf32>
    %cst_51 = arith.constant 0.000000e+00 : f32
    %126 = vector.shape_cast %46 : vector<1x256xi1> to vector<1x256xi1>
    %127 = vector.broadcast %126 : vector<1x256xi1> to vector<4x256xi1>
    %128 = vector.broadcast %cst_51 : f32 to vector<4x256xf32>
    %129 = arith.select %127, %125, %128 : vector<4x256xi1>, vector<4x256xf32>
    %130 = vector.extract_strided_slice %48 {offsets = [32, 0], sizes = [4, 4], strides = [1, 1]} : vector<36x4xf32> to vector<4x4xf32>
    %cst_52 = arith.constant dense<0.000000e+00> : vector<4x256xf32>
    %131 = tpu.matmul %130, %129, %cst_52 {dimension_numbers = #tpu.dot_dimension_numbers<[1], [0], [0], [1], [0, 0, 1, 1], [], []>} : vector<4x4xf32>, vector<4x256xf32>, vector<4x256xf32> -> vector<4x256xf32>
    %132 = arith.addf %124, %131 : vector<4x256xf32>
    %c0_53 = arith.constant 0 : index
    %c0_54 = arith.constant 0 : index
    %133 = vector.load %arg5[%c0_53, %c0_54] : memref<8x256xf32, #tpu.memory_space<vmem>>, vector<4x256xf32>
    tpu.vector_store %arg5[%c0_53, %c0_54], %132 {strides = array<i32>} : memref<8x256xf32, #tpu.memory_space<vmem>>, vector<4x256xf32>,
    %134 = vector.extract_strided_slice %51 {offsets = [4, 0], sizes = [4, 256], strides = [1, 1]} : vector<8x256xf32> to vector<4x256xf32>
    %135 = vector.broadcast %50 : vector<4x1xf32> to vector<4x256xf32>
    %136 = arith.addf %134, %135 : vector<4x256xf32>
    %c4 = arith.constant 4 : index
    %c111_55 = arith.constant 111 : index
    %137 = vector.load %arg6[%c4, %c111_55] : memref<8x512xf32, #tpu.memory_space<vmem>>, vector<4x256xf32>
    %cst_56 = arith.constant 0.000000e+00 : f32
    %138 = vector.shape_cast %28 : vector<1x256xi1> to vector<1x256xi1>
    %139 = vector.broadcast %138 : vector<1x256xi1> to vector<4x256xi1>
    %140 = vector.broadcast %cst_56 : f32 to vector<4x256xf32>
    %141 = arith.select %139, %137, %140 : vector<4x256xi1>, vector<4x256xf32>
    %142 = vector.extract_strided_slice %48 {offsets = [0, 0], sizes = [4, 4], strides = [1, 1]} : vector<36x4xf32> to vector<4x4xf32>
    %cst_57 = arith.constant dense<0.000000e+00> : vector<4x256xf32>
    %143 = tpu.matmul %142, %141, %cst_57 {dimension_numbers = #tpu.dot_dimension_numbers<[1], [0], [0], [1], [0, 0, 1, 1], [], []>} : vector<4x4xf32>, vector<4x256xf32>, vector<4x256xf32> -> vector<4x256xf32>
    %144 = arith.addf %136, %143 : vector<4x256xf32>
    %c4_58 = arith.constant 4 : index
    %c112_59 = arith.constant 112 : index
    %145 = vector.load %arg6[%c4_58, %c112_59] : memref<8x512xf32, #tpu.memory_space<vmem>>, vector<4x256xf32>
    %cst_60 = arith.constant 0.000000e+00 : f32
    %146 = vector.shape_cast %37 : vector<1x256xi1> to vector<1x256xi1>
    %147 = vector.broadcast %146 : vector<1x256xi1> to vector<4x256xi1>
    %148 = vector.broadcast %cst_60 : f32 to vector<4x256xf32>
    %149 = arith.select %147, %145, %148 : vector<4x256xi1>, vector<4x256xf32>
    %150 = vector.extract_strided_slice %48 {offsets = [4, 0], sizes = [4, 4], strides = [1, 1]} : vector<36x4xf32> to vector<4x4xf32>
    %cst_61 = arith.constant dense<0.000000e+00> : vector<4x256xf32>
    %151 = tpu.matmul %150, %149, %cst_61 {dimension_numbers = #tpu.dot_dimension_numbers<[1], [0], [0], [1], [0, 0, 1, 1], [], []>} : vector<4x4xf32>, vector<4x256xf32>, vector<4x256xf32> -> vector<4x256xf32>
    %152 = arith.addf %144, %151 : vector<4x256xf32>
    %c4_62 = arith.constant 4 : index
    %c113_63 = arith.constant 113 : index
    %153 = vector.load %arg6[%c4_62, %c113_63] : memref<8x512xf32, #tpu.memory_space<vmem>>, vector<4x256xf32>
    %cst_64 = arith.constant 0.000000e+00 : f32
    %154 = vector.shape_cast %46 : vector<1x256xi1> to vector<1x256xi1>
    %155 = vector.broadcast %154 : vector<1x256xi1> to vector<4x256xi1>
    %156 = vector.broadcast %cst_64 : f32 to vector<4x256xf32>
    %157 = arith.select %155, %153, %156 : vector<4x256xi1>, vector<4x256xf32>
    %158 = vector.extract_strided_slice %48 {offsets = [8, 0], sizes = [4, 4], strides = [1, 1]} : vector<36x4xf32> to vector<4x4xf32>
    %cst_65 = arith.constant dense<0.000000e+00> : vector<4x256xf32>
    %159 = tpu.matmul %158, %157, %cst_65 {dimension_numbers = #tpu.dot_dimension_numbers<[1], [0], [0], [1], [0, 0, 1, 1], [], []>} : vector<4x4xf32>, vector<4x256xf32>, vector<4x256xf32> -> vector<4x256xf32>
    %160 = arith.addf %152, %159 : vector<4x256xf32>
    %c4_66 = arith.constant 4 : index
    %c127_67 = arith.constant 127 : index
    %161 = vector.load %arg6[%c4_66, %c127_67] : memref<8x512xf32, #tpu.memory_space<vmem>>, vector<4x256xf32>
    %cst_68 = arith.constant 0.000000e+00 : f32
    %162 = vector.shape_cast %28 : vector<1x256xi1> to vector<1x256xi1>
    %163 = vector.broadcast %162 : vector<1x256xi1> to vector<4x256xi1>
    %164 = vector.broadcast %cst_68 : f32 to vector<4x256xf32>
    %165 = arith.select %163, %161, %164 : vector<4x256xi1>, vector<4x256xf32>
    %166 = vector.extract_strided_slice %48 {offsets = [12, 0], sizes = [4, 4], strides = [1, 1]} : vector<36x4xf32> to vector<4x4xf32>
    %cst_69 = arith.constant dense<0.000000e+00> : vector<4x256xf32>
    %167 = tpu.matmul %166, %165, %cst_69 {dimension_numbers = #tpu.dot_dimension_numbers<[1], [0], [0], [1], [0, 0, 1, 1], [], []>} : vector<4x4xf32>, vector<4x256xf32>, vector<4x256xf32> -> vector<4x256xf32>
    %168 = arith.addf %160, %167 : vector<4x256xf32>
    %c4_70 = arith.constant 4 : index
    %c128_71 = arith.constant 128 : index
    %169 = vector.load %arg6[%c4_70, %c128_71] : memref<8x512xf32, #tpu.memory_space<vmem>>, vector<4x256xf32>
    %cst_72 = arith.constant 0.000000e+00 : f32
    %170 = vector.shape_cast %37 : vector<1x256xi1> to vector<1x256xi1>
    %171 = vector.broadcast %170 : vector<1x256xi1> to vector<4x256xi1>
    %172 = vector.broadcast %cst_72 : f32 to vector<4x256xf32>
    %173 = arith.select %171, %169, %172 : vector<4x256xi1>, vector<4x256xf32>
    %174 = vector.extract_strided_slice %48 {offsets = [16, 0], sizes = [4, 4], strides = [1, 1]} : vector<36x4xf32> to vector<4x4xf32>
    %cst_73 = arith.constant dense<0.000000e+00> : vector<4x256xf32>
    %175 = tpu.matmul %174, %173, %cst_73 {dimension_numbers = #tpu.dot_dimension_numbers<[1], [0], [0], [1], [0, 0, 1, 1], [], []>} : vector<4x4xf32>, vector<4x256xf32>, vector<4x256xf32> -> vector<4x256xf32>
    %176 = arith.addf %168, %175 : vector<4x256xf32>
    %c4_74 = arith.constant 4 : index
    %c129_75 = arith.constant 129 : index
    %177 = vector.load %arg6[%c4_74, %c129_75] : memref<8x512xf32, #tpu.memory_space<vmem>>, vector<4x256xf32>
    %cst_76 = arith.constant 0.000000e+00 : f32
    %178 = vector.shape_cast %46 : vector<1x256xi1> to vector<1x256xi1>
    %179 = vector.broadcast %178 : vector<1x256xi1> to vector<4x256xi1>
    %180 = vector.broadcast %cst_76 : f32 to vector<4x256xf32>
    %181 = arith.select %179, %177, %180 : vector<4x256xi1>, vector<4x256xf32>
    %182 = vector.extract_strided_slice %48 {offsets = [20, 0], sizes = [4, 4], strides = [1, 1]} : vector<36x4xf32> to vector<4x4xf32>
    %cst_77 = arith.constant dense<0.000000e+00> : vector<4x256xf32>
    %183 = tpu.matmul %182, %181, %cst_77 {dimension_numbers = #tpu.dot_dimension_numbers<[1], [0], [0], [1], [0, 0, 1, 1], [], []>} : vector<4x4xf32>, vector<4x256xf32>, vector<4x256xf32> -> vector<4x256xf32>
    %184 = arith.addf %176, %183 : vector<4x256xf32>
    %c4_78 = arith.constant 4 : index
    %c143_79 = arith.constant 143 : index
    %185 = vector.load %arg6[%c4_78, %c143_79] : memref<8x512xf32, #tpu.memory_space<vmem>>, vector<4x256xf32>
    %cst_80 = arith.constant 0.000000e+00 : f32
    %186 = vector.shape_cast %28 : vector<1x256xi1> to vector<1x256xi1>
    %187 = vector.broadcast %186 : vector<1x256xi1> to vector<4x256xi1>
    %188 = vector.broadcast %cst_80 : f32 to vector<4x256xf32>
    %189 = arith.select %187, %185, %188 : vector<4x256xi1>, vector<4x256xf32>
    %190 = vector.extract_strided_slice %48 {offsets = [24, 0], sizes = [4, 4], strides = [1, 1]} : vector<36x4xf32> to vector<4x4xf32>
    %cst_81 = arith.constant dense<0.000000e+00> : vector<4x256xf32>
    %191 = tpu.matmul %190, %189, %cst_81 {dimension_numbers = #tpu.dot_dimension_numbers<[1], [0], [0], [1], [0, 0, 1, 1], [], []>} : vector<4x4xf32>, vector<4x256xf32>, vector<4x256xf32> -> vector<4x256xf32>
    %192 = arith.addf %184, %191 : vector<4x256xf32>
    %c4_82 = arith.constant 4 : index
    %c144_83 = arith.constant 144 : index
    %193 = vector.load %arg6[%c4_82, %c144_83] : memref<8x512xf32, #tpu.memory_space<vmem>>, vector<4x256xf32>
    %cst_84 = arith.constant 0.000000e+00 : f32
    %194 = vector.shape_cast %37 : vector<1x256xi1> to vector<1x256xi1>
    %195 = vector.broadcast %194 : vector<1x256xi1> to vector<4x256xi1>
    %196 = vector.broadcast %cst_84 : f32 to vector<4x256xf32>
    %197 = arith.select %195, %193, %196 : vector<4x256xi1>, vector<4x256xf32>
    %198 = vector.extract_strided_slice %48 {offsets = [28, 0], sizes = [4, 4], strides = [1, 1]} : vector<36x4xf32> to vector<4x4xf32>
    %cst_85 = arith.constant dense<0.000000e+00> : vector<4x256xf32>
    %199 = tpu.matmul %198, %197, %cst_85 {dimension_numbers = #tpu.dot_dimension_numbers<[1], [0], [0], [1], [0, 0, 1, 1], [], []>} : vector<4x4xf32>, vector<4x256xf32>, vector<4x256xf32> -> vector<4x256xf32>
    %200 = arith.addf %192, %199 : vector<4x256xf32>
    %c4_86 = arith.constant 4 : index
    %c145_87 = arith.constant 145 : index
    %201 = vector.load %arg6[%c4_86, %c145_87] : memref<8x512xf32, #tpu.memory_space<vmem>>, vector<4x256xf32>
    %cst_88 = arith.constant 0.000000e+00 : f32
    %202 = vector.shape_cast %46 : vector<1x256xi1> to vector<1x256xi1>
    %203 = vector.broadcast %202 : vector<1x256xi1> to vector<4x256xi1>
    %204 = vector.broadcast %cst_88 : f32 to vector<4x256xf32>
    %205 = arith.select %203, %201, %204 : vector<4x256xi1>, vector<4x256xf32>
    %206 = vector.extract_strided_slice %48 {offsets = [32, 0], sizes = [4, 4], strides = [1, 1]} : vector<36x4xf32> to vector<4x4xf32>
    %cst_89 = arith.constant dense<0.000000e+00> : vector<4x256xf32>
    %207 = tpu.matmul %206, %205, %cst_89 {dimension_numbers = #tpu.dot_dimension_numbers<[1], [0], [0], [1], [0, 0, 1, 1], [], []>} : vector<4x4xf32>, vector<4x256xf32>, vector<4x256xf32> -> vector<4x256xf32>
    %208 = arith.addf %200, %207 : vector<4x256xf32>
    %c4_90 = arith.constant 4 : index
    %c0_91 = arith.constant 0 : index
    %209 = vector.load %arg5[%c4_90, %c0_91] : memref<8x256xf32, #tpu.memory_space<vmem>>, vector<4x256xf32>
    tpu.vector_store %arg5[%c4_90, %c0_91], %208 {strides = array<i32>} : memref<8x256xf32, #tpu.memory_space<vmem>>, vector<4x256xf32>,
    return
  }
  func.func @transform_0(%arg0: i32, %arg1: i32) -> (i32, i32) {
    %c0_i32 = arith.constant 0 : i32
    %c0_i32_0 = arith.constant 0 : i32
    return %arg0, %c0_i32 : i32, i32
  }
  func.func @transform_1(%arg0: i32, %arg1: i32) -> (i32, i32, i32) {
    %c0_i32 = arith.constant 0 : i32
    %c0_i32_0 = arith.constant 0 : i32
    %c0_i32_1 = arith.constant 0 : i32
    return %arg1, %c0_i32, %c0_i32_0 : i32, i32, i32
  }
  func.func @transform_2(%arg0: i32, %arg1: i32) -> (i32, i32, i32) {
    %c0_i32 = arith.constant 0 : i32
    %c0_i32_0 = arith.constant 0 : i32
    %c0_i32_1 = arith.constant 0 : i32
    return %arg1, %c0_i32, %c0_i32_0 : i32, i32, i32
  }
  func.func @transform_3(%arg0: i32, %arg1: i32) -> (i32, i32) {
    %c0_i32 = arith.constant 0 : i32
    %c0_i32_0 = arith.constant 0 : i32
    return %arg0, %c0_i32 : i32, i32
  }
}

</mosaic_0001>

<bundles_post_ra>
// kernel: tpu_custom_call.1
= control target key start
LH: loop header
LB: loop body
LE: loop exit
PB: predicated region body
PF: predicated region fallthrough
CT: control target
= control target key end

     0   :  { %8 = vsyncpa [#allocation4], 0  ;;  %s2355_s12 = smov 0   ;;  %s2357_s13 = smov 0   ;;  %s2672_s0 = inlined_call_operand.vmem [shape: f32[8,256], index: 0, kind: input, shape index: {}]   ;;  %s2673_s1 = inlined_call_operand.vmem [shape: f32[2,36,4], index: 1, kind: input, shape index: {}]   ;;  %s2674_s2 = inlined_call_operand.vmem [shape: f32[2,4,1], index: 2, kind: input, shape index: {}]   ;;  %s2675_s3 = inlined_call_operand.hbm [shape: f32[8,256], index: 3, kind: output, shape index: {}]  }
   0x1   :  { %s2359_s14 = smov 0  }
   0x2 LB: > { %s2141_s15 = sadd.s32 4294967295, %s2321_s14   ;;  %s23_s16 = sadd.s32 1, %s2317_s13  ;;  %s2321_s14 = sphi %s2359_s14, %s14_s14   ;;  %s2317_s13 = sphi %s2357_s13, %s2678_s13   ;;  %s2313_s12 = sphi %s2355_s12, %s2677_s12  }
   0x3   : > { %p24_p0 = scmp.ge.s32.totalorder %s23_s16, 2  ;;  %p2145_p1 = scmp.ge.s32.totalorder %s2321_s14, 1 }
   0x4   : > { %p169_p2 = scmp.lt.s32.totalorder %s2321_s14, 3 }
   0x5   : > { %s2680_s16 = smov (%p24_p0, %s23_s16), 0 }
   0x6   : > { %p170_p3 = pnand %p2145_p1, %p169_p2 }
   0x7   : > { %p202_p4 = scmp.lt.s32.totalorder (!%p170_p3), %s2313_s12, 1  ;;  %p2148_p5 = scmp.ne.s32.totalorder (!%p170_p3), %s2313_s12, 0 }
   0x8   : > { %173 = sbr.rel (%p170_p3) target bundleno = 477 (0x1dd), region = 32 }
   0xf   : > { %s203_s17 = scalar_select %p202_p4, %s2313_s12, 1 }
  0x10   : > { %214 = sbr.rel (%p2148_p5) target bundleno = 23 (0x17), region = 36  ;;  %v215_v0 = vld [vmem:[%s2672_s0] sm:$0xff] (!%p2148_p5)  ;;  %v216_v1 = vld [vmem:[%s2672_s0 + $0x8] sm:$0xff] (!%p2148_p5)  ;;  %v2323_v2 = vmov (!%p2148_p5), 0.0  }
  0x11   : > { %s2225_s18 = smul.u32 40, %s203_s17  ;;  %s2147_s19 = sshll.u32 %s203_s17, 2  ;;  %217 = vst [vmem:[#allocation3] sm:$0xff] (!%p2148_p5), %v215_v0  ;;  %218 = vst [vmem:[#allocation3 + $0x8] sm:$0xff] (!%p2148_p5), %v216_v1 }
  0x12   : > { %s2377_s22 = scalar_lea.vmem %s2674_s2, %s2147_s19  ;;  %219 = vst [vmem:[#allocation2] sm:$0xff] (!%p2148_p5), %v2323_v2  ;;  %220 = vst [vmem:[#allocation2 + $0x18] sm:$0xff] (!%p2148_p5), %v2323_v2 }
  0x13   : > { %s2382_s25 = scalar_lea.vmem %s2673_s1, %s2225_s18 }
  0x17 PF: > { %s2324_s30 = smov 17   ;;  %s2325_s4 = smov 16   ;;  %v2326_v10 = vmov 0.0   ;;  %v2333_v28 = vmov 0   ;;  %v275_v29 = vld [vmem:[%s2377_s22] sm:$0xf]  ;;  %v221_v30 = vlaneseq }
  0x18   : > { %v2390_v4 = vld [vmem:[#allocation3] sm:$0xff]  ;;  %v2392_v5 = vld [vmem:[#allocation3 + $0x8] sm:$0xff]  ;;  %391 = vmatprep.mubr.f32.mxu0 %v2326_v10  ;;  %1260 = vmatprep.mubr.f32.mxu1 %v2326_v10  ;;  %s2327_s5 = smov 15   ;;  %s2328_s6 = smov 1   ;;  %vm309_vm2 = vcmask 138240   ;;  %vm320_vm4 = vcmask 1043456  }
  0x19   : > { %v293_v3 = vld [vmem:[#allocation2] sm:$0xf]  ;;  %vm278_vm0 = vcmp.gt.f32.partialorder %v2390_v4, 0.0  ;;  %v280_v6 = vmul.f32 0.01, %v2390_v4  ;;  %vm279_vm1 = vcmp.gt.f32.partialorder %v2392_v5, 0.0  ;;  %2268 = vset.pattern.permute.xlu0 %v2333_v28 }
  0x1a   : > { %303 = vrot.lane.b32.xlu1 %v293_v3, %s2324_s30  ;;  %v281_v7 = vmul.f32 0.01, %v2392_v5  ;;  %v1169_v17 = vld [vmem:[#allocation2] sm:$0xf0]  ;;  %s2329_s7 = smov 127   ;;  %s2330_s8 = smov 113  }
  0x1b   : > { %v282_v8 = vsel %vm278_vm0, %v2390_v4, %v280_v6  ;;  %v1175_v18 = vrot.slane %v1169_v17, 4  ;;  %v779_v21 = vld [vmem:[#allocation2 + $0x18] sm:$0xf]  ;;  %v1657_v22 = vld [vmem:[#allocation2 + $0x18] sm:$0xf0]  ;;  %s2331_s9 = smov 112  }
  0x1c   : > { %v283_v9 = vsel %vm279_vm1, %v2392_v5, %v281_v7  ;;  %284 = vst [vmem:[#allocation2 + $0x8] sm:$0xff] %v282_v8  ;;  %v1663_v23 = vrot.slane %v1657_v22, 4  ;;  %s2332_s10 = smov 111   ;;  %v222_v32 = vand.u32 127, %v221_v30  ;;  %v2456_v46 = vld [vmem:[%s2382_s25] sm:$0xff]  ;;  %vm316_vm6 = vcmask 31744  }
  0x1d   : > { %285 = vst [vmem:[#allocation2 + $0x10] sm:$0xff] %v283_v9  ;;  %vm410_vm7 = vcmask 130048   ;;  %vm509_vm8 = vcmask 121856   ;;  %v417_v56 = vrot.slane %v2456_v46, 4  ;;  %vm604_vm11 = vcmask 7168   ;;  %v2491_v6 = vld [vmem:[%s2382_s25 + $0x8] sm:$0xff] }
  0x1e   : > { %404 = vrot.lane.b32.xlu1 %v293_v3, %s2325_s4  ;;  %v223_v33 = vadd.s32 128, %v222_v32  ;;  %v228_v36 = vand.u32 15, %v222_v32  ;;  %vm789_vm12 = vcmask 1039360   ;;  %vm884_vm13 = vcmask 924672   ;;  %s2334_s11 = smov [#allocation3]   ;;  %p2637_p6 = scmp.eq.s32.totalorder %s2141_s15, 1 }
  0x1f   : > { %vm979_vm14 = vcmask 916480   ;;  %vm1074_vm15 = vcmask 908288   ;;  %s2064_s12 = sshll.u32 %s2334_s11, 4  ;;  %s2065_s12 = int_to_ptr.vmem [resolvable:$true] %s2064_s12 }
  0x20   : > { %v235_v35 = vand.u32 15, %v223_v33  ;;  %v2447_v40 = vadd.s32 4294967295, %v228_v36  ;;  %v2472_v53 = vadd.s32 1, %v228_v36  ;;  %s2269_s18 = scalar_lea.vmem %s2065_s12, 256  ;;  %p2276_p10 = scmp.lt.s32.totalorder %s2065_s12, %s2065_s12 }
  0x21   : > { %p2270_p7 = scmp.ne.s32.totalorder %s2065_s12, %s2269_s18  ;;  %p2277_p11 = scmp.lt.s32.totalorder %s2269_s18, %s2269_s18 }
  0x22   : > { %v2445_v37 = vadd.s32 4294967295, %v235_v35  ;;  %vm250_vm5 = vcmp.ge.s32.totalorder %v2447_v40, 0  ;;  %v2461_v48 = vadd.s32 1, %v235_v35  ;;  %vm266_vm10 = vcmp.lt.s32.totalorder %v2472_v53, 16 }
  0x23   : > { %v2404_v11 = vld [vmem:[#allocation2 + $0x8] sm:$0xf]  ;;  %v1170_v15 = vld [vmem:[#allocation2 + $0x8] sm:$0xf0]  ;;  %p2271_p8 = pnand %p2270_p7, %p2637_p6  ;;  %p2278_p12 = por %p2277_p11, %p2276_p10 }
  0x24   : > { %305 = vrot.lane.b32.xlu0 %v2404_v11, %s2324_s30  ;;  %406 = vrot.lane.b32.xlu1 %v2404_v11, %s2325_s4  ;;  %v2410_v12 = vld [vmem:[#allocation2 + $0x10] sm:$0xf]  ;;  %v1171_v13 = vld [vmem:[#allocation2 + $0x10] sm:$0xf0]  ;;  %v2425_v16 = vrot.slane %v1170_v15, 4  ;;  %vm251_vm3 = vcmp.ge.s32.totalorder %v2445_v37, 0 }
  0x25   : > { %v2421_v14 = vrot.slane %v1171_v13, 4  ;;  %v778_v19 = vld [vmem:[#allocation2 + $0x10] sm:$0xf]  ;;  %v777_v20 = vld [vmem:[#allocation2 + $0x8] sm:$0xf]  ;;  %vm267_vm9 = vcmp.lt.s32.totalorder %v2461_v48, 16  ;;  %p2272_p9 = pneg %p2271_p8 }
  0x26   : > { %v1656_v24 = vld [vmem:[#allocation2 + $0x10] sm:$0xf0]  ;;  %v1655_v26 = vld [vmem:[#allocation2 + $0x8] sm:$0xf0] }
  0x27   : > { %v1662_v25 = vrot.slane %v1656_v24, 4  ;;  %v1661_v27 = vrot.slane %v1655_v26, 4  ;;  %p2279_p13 = pnand %p2278_p12, %p2272_p9 }
  0x28   : > { %307 = vrot.lane.b32.xlu0 %v2410_v12, %s2324_s30  ;;  %507 = vrot.lane.b32.xlu1 %v2410_v12, %s2327_s5 }
  0x2c   : > { %408 = vrot.lane.b32.xlu0 %v2410_v12, %s2325_s4  ;;  %600 = vrot.lane.b32.xlu1 %v2404_v11, %s2328_s6 }
  0x30   : > { %505 = vrot.lane.b32.xlu0 %v2404_v11, %s2327_s5  ;;  %598 = vrot.lane.b32.xlu1 %v293_v3, %s2328_s6 }
  0x34   : > { %503 = vrot.lane.b32.xlu0 %v293_v3, %s2327_s5  ;;  %1182 = vrot.lane.b32.xlu1 %v2421_v14, %s2324_s30 }
  0x38   : > { %602 = vrot.lane.b32.xlu0 %v2410_v12, %s2328_s6  ;;  %1277 = vrot.lane.b32.xlu1 %v2425_v16, %s2325_s4 }
  0x3c   : > { %1180 = vrot.lane.b32.xlu0 %v2425_v16, %s2324_s30  ;;  %1275 = vrot.lane.b32.xlu1 %v1175_v18, %s2325_s4 }
  0x40   : > { %1178 = vrot.lane.b32.xlu0 %v1175_v18, %s2324_s30  ;;  %1376 = vrot.lane.b32.xlu1 %v2421_v14, %s2327_s5 }
  0x44   : > { %1279 = vrot.lane.b32.xlu0 %v2421_v14, %s2325_s4  ;;  %785 = vrot.lane.b32.xlu1 %v778_v19, %s2329_s7 }
  0x48   : > { %1374 = vrot.lane.b32.xlu0 %v2425_v16, %s2327_s5  ;;  %783 = vrot.lane.b32.xlu1 %v777_v20, %s2329_s7 }
  0x4c   : > { %1372 = vrot.lane.b32.xlu0 %v1175_v18, %s2327_s5  ;;  %1473 = vrot.lane.b32.xlu1 %v2421_v14, %s2328_s6 }
  0x50   : > { %787 = vrot.lane.b32.xlu0 %v779_v21, %s2329_s7  ;;  %880 = vrot.lane.b32.xlu1 %v778_v19, %s2330_s8 }
  0x54   : > { %1471 = vrot.lane.b32.xlu0 %v2425_v16, %s2328_s6  ;;  %878 = vrot.lane.b32.xlu1 %v777_v20, %s2330_s8 }
  0x58   : > { %1469 = vrot.lane.b32.xlu0 %v1175_v18, %s2328_s6  ;;  %1668 = vrot.lane.b32.xlu1 %v1663_v23, %s2329_s7 }
  0x5c   : > { %882 = vrot.lane.b32.xlu0 %v779_v21, %s2330_s8  ;;  %1763 = vrot.lane.b32.xlu1 %v1662_v25, %s2330_s8 }
  0x60   : > { %1666 = vrot.lane.b32.xlu0 %v1662_v25, %s2329_s7  ;;  %1761 = vrot.lane.b32.xlu1 %v1661_v27, %s2330_s8 }
  0x64   : > { %1664 = vrot.lane.b32.xlu0 %v1661_v27, %s2329_s7  ;;  %977 = vrot.lane.b32.xlu1 %v779_v21, %s2331_s9 }
  0x68   : > { %1765 = vrot.lane.b32.xlu0 %v1663_v23, %s2330_s8  ;;  %1860 = vrot.lane.b32.xlu1 %v1662_v25, %s2331_s9 }
  0x6c   : > { %975 = vrot.lane.b32.xlu0 %v778_v19, %s2331_s9  ;;  %1858 = vrot.lane.b32.xlu1 %v1661_v27, %s2331_s9 }
  0x70   : > { %973 = vrot.lane.b32.xlu0 %v777_v20, %s2331_s9  ;;  %1959 = vrot.lane.b32.xlu1 %v1663_v23, %s2332_s10 }
  0x74   : > { %1862 = vrot.lane.b32.xlu0 %v1663_v23, %s2331_s9  ;;  %1070 = vrot.lane.b32.xlu1 %v778_v19, %s2332_s10  ;;  %v611_v19 = vrot.slane %v2491_v6, 4 }
  0x78   : > { %1957 = vrot.lane.b32.xlu0 %v1662_v25, %s2332_s10  ;;  %1068 = vrot.lane.b32.xlu1 %v777_v20, %s2332_s10 }
  0x7c   : > { %1955 = vrot.lane.b32.xlu0 %v1661_v27, %s2332_s10 }
  0x80   : > { %1072 = vrot.lane.b32.xlu0 %v779_v21, %s2332_s10 }
  0x84   : > { %288 = vperm.xlu0 %2268, %v275_v29   ;;  %v2528_v29 = vld [vmem:[%s2382_s25 + $0x10] sm:$0xff] }
  0x8c   : > { %v304_v31 = vpop.permute.xlu1 %303 }
  0x90   : > { %v405_v34 = vpop.permute.xlu1 %404 }
  0x96   : > { %v306_v38 = vpop.permute.xlu0 %305  ;;  %v407_v39 = vpop.permute.xlu1 %406 }
  0x97   : > { %v310_v41 = vsel %vm309_vm2, %v304_v31, %v306_v38  ;;  %v411_v52 = vsel %vm410_vm7, %v405_v34, %v407_v39 }
  0x98   : > { %v314_v47 = vsel %vm250_vm5, %v310_v41, 0.0 }
  0x9a   : > { %v308_v42 = vpop.permute.xlu0 %307  ;;  %v508_v43 = vpop.permute.xlu1 %507 }
  0x9b   : > { %v311_v44 = vsel %vm309_vm2, %v306_v38, %v308_v42  ;;  %v796_v38 = vrot.slane %v2528_v29, 4 }
  0x9c   : > { %v315_v45 = vsel %vm251_vm3, %v311_v44, 0.0 }
  0x9d   : > { %2149 = vmatprep.subr.msk.mxu0 %vm320_vm4, %v315_v45 }
  0x9e   : > { %v409_v49 = vpop.permute.xlu0 %408  ;;  %2150 = vmatpush1.msk.msra.mxu0 %vm320_vm4, %v314_v47  ;;  %v601_v50 = vpop.permute.xlu1 %600 }
  0x9f   : > { %v412_v51 = vsel %vm410_vm7, %v407_v39, %v409_v49  ;;  %2151 = vmatmul.mubr.msk.f32.vlgmr.msra.gmra.mrb[0].mxu0 %vm316_vm6, %v2456_v46 }
  0xa0   : > { %2152 = vmatprep.subr.msk.mxu0 %vm320_vm4, %v412_v51  ;;  %490 = vmatprep.mubr.f32.mxu0 %v2326_v10 }
  0xa1   : > { %2153 = vmatpush1.msk.msra.mxu0 %vm320_vm4, %v411_v52 }
  0xa2   : > { %v506_v54 = vpop.permute.xlu0 %505  ;;  %v599_v55 = vpop.permute.xlu1 %598 }
  0xa3   : > { %v511_v57 = vsel %vm509_vm8, %v506_v54, %v508_v43  ;;  %v605_v2 = vsel %vm604_vm11, %v599_v55, %v601_v50 }
  0xa4   : > { %v515_v58 = vsel %vm267_vm9, %v511_v57, 0.0  ;;  %v609_v9 = vsel %vm250_vm5, %v605_v2, 0.0 }
  0xa5   : > { %2155 = vmatprep.subr.msk.mxu0 %vm320_vm4, %v515_v58 }
  0xa6   : > { %v504_v59 = vpop.permute.xlu0 %503  ;;  %v1183_v60 = vpop.permute.xlu1 %1182 }
  0xa7   : > { %v510_v61 = vsel %vm509_vm8, %v504_v59, %v506_v54  ;;  %2154 = vmatmul.mubr.msk.f32.vlgmr.msra.gmra.mrb[0].mxu0 %vm316_vm6, %v417_v56  ;;  %v273_v59 = vld [vmem:[%s2382_s25 + $0x18] sm:$0xff] }
  0xa8   : > { %v514_v62 = vsel %vm266_vm10, %v510_v61, 0.0  ;;  %589 = vmatprep.mubr.f32.mxu0 %v2326_v10 }
  0xa9   : > { %2156 = vmatpush1.msk.msra.mxu0 %vm320_vm4, %v514_v62 }
  0xaa   : > { %v603_v63 = vpop.permute.xlu0 %602  ;;  %v1278_v0 = vpop.permute.xlu1 %1277 }
  0xab   : > { %v606_v1 = vsel %vm604_vm11, %v601_v50, %v603_v63 }
  0xac   : > { %v610_v3 = vsel %vm251_vm3, %v606_v1, 0.0 }
  0xad   : > { %2158 = vmatprep.subr.msk.mxu0 %vm320_vm4, %v610_v3 }
  0xae   : > { %v1181_v7 = vpop.permute.xlu0 %1180  ;;  %v1276_v8 = vpop.permute.xlu1 %1275 }
  0xaf   : > { %2157 = vmatmul.mubr.msk.f32.vlgmr.msra.gmra.mrb[0].mxu0 %vm316_vm6, %v2491_v6  ;;  %v1185_v13 = vsel %vm309_vm2, %v1181_v7, %v1183_v60 }
  0xb0   : > { %2159 = vmatpush1.msk.msra.mxu0 %vm320_vm4, %v609_v9  ;;  %v1189_v15 = vsel %vm251_vm3, %v1185_v13, 0.0  ;;  %684 = vmatprep.mubr.f32.mxu0 %v2326_v10 }
  0xb1   : > { %2176 = vmatprep.subr.msk.mxu1 %vm320_vm4, %v1189_v15  ;;  %2161 = vmatprep.subr.msk.mxu0 %vm320_vm4, %v2410_v12  ;;  %v1281_v12 = vsel %vm410_vm7, %v1276_v8, %v1278_v0 }
  0xb2   : > { %v1179_v17 = vpop.permute.xlu0 %1178  ;;  %v1377_v18 = vpop.permute.xlu1 %1376 }
  0xb3   : > { %v1184_v20 = vsel %vm309_vm2, %v1179_v17, %v1181_v7 }
  0xb4   : > { %v1188_v21 = vsel %vm250_vm5, %v1184_v20, 0.0 }
  0xb5   : > { %2177 = vmatpush1.msk.msra.mxu1 %vm320_vm4, %v1188_v21 }
  0xb6   : > { %v1280_v22 = vpop.permute.xlu0 %1279  ;;  %2178 = vmatmul.mubr.msk.f32.vlgmr.msra.gmra.mrb[0].mxu1 %vm316_vm6, %v2456_v46  ;;  %v786_v23 = vpop.permute.xlu1 %785 }
  0xb7   : > { %v1282_v24 = vsel %vm410_vm7, %v1278_v0, %v1280_v22  ;;  %2160 = vmatmul.mubr.msk.f32.vlgmr.msra.gmra.mrb[0].mxu0 %vm316_vm6, %v611_v19  ;;  %1357 = vmatprep.mubr.f32.mxu1 %v2326_v10 }
  0xb8   : > { %2179 = vmatprep.subr.msk.mxu1 %vm320_vm4, %v1282_v24  ;;  %2162 = vmatpush1.msk.msra.mxu0 %vm320_vm4, %v2404_v11 }
  0xb9   : > { %2180 = vmatpush1.msk.msra.mxu1 %vm320_vm4, %v1281_v12  ;;  %768 = vmatprep.mubr.f32.mxu0 %v2326_v10 }
  0xba   : > { %v1375_v25 = vpop.permute.xlu0 %1374  ;;  %v784_v26 = vpop.permute.xlu1 %783  ;;  %2181 = vmatmul.mubr.msk.f32.vlgmr.msra.gmra.mrb[2].mxu1 %vm316_vm6, %v417_v56 }
  0xbb   : > { %v1379_v27 = vsel %vm509_vm8, %v1375_v25, %v1377_v18  ;;  %1454 = vmatprep.mubr.f32.mxu1 %v2326_v10  ;;  %v790_v33 = vsel %vm789_vm12, %v784_v26, %v786_v23  ;;  %v986_v18 = vrot.slane %v273_v59, 4 }
  0xbc   : > { %v1383_v28 = vsel %vm267_vm9, %v1379_v27, 0.0  ;;  %v794_v41 = vsel %vm266_vm10, %v790_v33, 0.0 }
  0xbd   : > { %2182 = vmatprep.subr.msk.mxu1 %vm320_vm4, %v1383_v28  ;;  %v274_v28 = vld [vmem:[%s2382_s25 + $0x20] sm:$0xf] }
  0xbe   : > { %v1373_v11 = vpop.permute.xlu0 %1372  ;;  %v1474_v30 = vpop.permute.xlu1 %1473 }
  0xbf   : > { %v1378_v31 = vsel %vm509_vm8, %v1373_v11, %v1375_v25  ;;  %2163 = vmatmul.mubr.msk.f32.vlgmr.msra.gmra.mrb[0].mxu0 %vm316_vm6, %v2528_v29 }
  0xc0   : > { %v1382_v32 = vsel %vm266_vm10, %v1378_v31, 0.0  ;;  %869 = vmatprep.mubr.f32.mxu0 %v2326_v10 }
  0xc1   : > { %2183 = vmatpush1.msk.msra.mxu1 %vm320_vm4, %v1382_v32 }
  0xc2   : > { %v788_v34 = vpop.permute.xlu0 %787  ;;  %v881_v35 = vpop.permute.xlu1 %880  ;;  %2184 = vmatmul.mubr.msk.f32.vlgmr.msra.gmra.mrb[4].mxu1 %vm316_vm6, %v2491_v6 }
  0xc3   : > { %v791_v36 = vsel %vm789_vm12, %v786_v23, %v788_v34  ;;  %1551 = vmatprep.mubr.f32.mxu1 %v2326_v10 }
  0xc4   : > { %v795_v39 = vsel %vm267_vm9, %v791_v36, 0.0 }
  0xc5   : > { %2164 = vmatprep.subr.msk.mxu0 %vm320_vm4, %v795_v39 }
  0xc6   : > { %v1472_v42 = vpop.permute.xlu0 %1471  ;;  %2165 = vmatpush1.msk.msra.mxu0 %vm320_vm4, %v794_v41  ;;  %v879_v43 = vpop.permute.xlu1 %878 }
  0xc7   : > { %v1476_v44 = vsel %vm604_vm11, %v1472_v42, %v1474_v30  ;;  %2166 = vmatmul.mubr.msk.f32.vlgmr.msra.gmra.mrb[0].mxu0 %vm316_vm6, %v796_v38  ;;  %v885_v51 = vsel %vm884_vm13, %v879_v43, %v881_v35 }
  0xc8   : > { %v1480_v45 = vsel %vm251_vm3, %v1476_v44, 0.0  ;;  %964 = vmatprep.mubr.f32.mxu0 %v2326_v10  ;;  %v889_v57 = vsel %vm250_vm5, %v885_v51, 0.0 }
  0xc9   : > { %2185 = vmatprep.subr.msk.mxu1 %vm320_vm4, %v1480_v45 }
  0xca   : > { %v1470_v46 = vpop.permute.xlu0 %1469  ;;  %v1669_v47 = vpop.permute.xlu1 %1668 }
  0xcb   : > { %v1475_v49 = vsel %vm604_vm11, %v1470_v46, %v1472_v42 }
  0xcc   : > { %v1479_v50 = vsel %vm250_vm5, %v1475_v49, 0.0 }
  0xcd   : > { %2186 = vmatpush1.msk.msra.mxu1 %vm320_vm4, %v1479_v50 }
  0xce   : > { %v883_v52 = vpop.permute.xlu0 %882  ;;  %v1764_v54 = vpop.permute.xlu1 %1763  ;;  %2188 = vmatprep.subr.msk.mxu1 %vm320_vm4, %v2421_v14  ;;  %2187 = vmatmul.mubr.msk.f32.vlgmr.msra.gmra.mrb[6].mxu1 %vm316_vm6, %v611_v19 }
  0xcf   : > { %v886_v55 = vsel %vm884_vm13, %v881_v35, %v883_v52  ;;  %2189 = vmatpush1.msk.msra.mxu1 %vm320_vm4, %v2425_v16  ;;  %1640 = vmatprep.mubr.f32.mxu1 %v2326_v10 }
  0xd0   : > { %v890_v56 = vsel %vm251_vm3, %v886_v55, 0.0 }
  0xd1   : > { %2167 = vmatprep.subr.msk.mxu0 %vm320_vm4, %v890_v56 }
  0xd2   : > { %v1667_v58 = vpop.permute.xlu0 %1666  ;;  %2168 = vmatpush1.msk.msra.mxu0 %vm320_vm4, %v889_v57  ;;  %v1762_v14 = vpop.permute.xlu1 %1761  ;;  %2190 = vmatmul.mubr.msk.f32.vlgmr.msra.gmra.mrb[8].mxu1 %vm316_vm6, %v2528_v29 }
  0xd3   : > { %v1671_v16 = vsel %vm789_vm12, %v1667_v58, %v1669_v47  ;;  %1746 = vmatprep.mubr.f32.mxu1 %v2326_v10  ;;  %2169 = vmatmul.mubr.msk.f32.vlgmr.msra.gmra.mrb[0].mxu0 %vm316_vm6, %v273_v59  ;;  %v1767_v1 = vsel %vm884_vm13, %v1762_v14, %v1764_v54 }
  0xd4   : > { %v1675_v60 = vsel %vm267_vm9, %v1671_v16, 0.0  ;;  %1059 = vmatprep.mubr.f32.mxu0 %v2326_v10  ;;  %v1771_v8 = vsel %vm250_vm5, %v1767_v1, 0.0 }
  0xd5   : > { %2191 = vmatprep.subr.msk.mxu1 %vm320_vm4, %v1675_v60 }
  0xd6   : > { %v1665_v61 = vpop.permute.xlu0 %1664  ;;  %v978_v62 = vpop.permute.xlu1 %977 }
  0xd7   : > { %v1670_v63 = vsel %vm789_vm12, %v1665_v61, %v1667_v58 }
  0xd8   : > { %v1674_v0 = vsel %vm266_vm10, %v1670_v63, 0.0 }
  0xd9   : > { %2192 = vmatpush1.msk.msra.mxu1 %vm320_vm4, %v1674_v0 }
  0xda   : > { %v1766_v2 = vpop.permute.xlu0 %1765  ;;  %2193 = vmatmul.mubr.msk.f32.vlgmr.msra.gmra.mrb[10].mxu1 %vm316_vm6, %v796_v38  ;;  %v1861_v3 = vpop.permute.xlu1 %1860 }
  0xdb   : > { %v1768_v6 = vsel %vm884_vm13, %v1764_v54, %v1766_v2  ;;  %1843 = vmatprep.mubr.f32.mxu1 %v2326_v10 }
  0xdc   : > { %v1772_v7 = vsel %vm251_vm3, %v1768_v6, 0.0 }
  0xdd   : > { %2194 = vmatprep.subr.msk.mxu1 %vm320_vm4, %v1772_v7 }
  0xde   : > { %v976_v9 = vpop.permute.xlu0 %975  ;;  %2195 = vmatpush1.msk.msra.mxu1 %vm320_vm4, %v1771_v8  ;;  %v1859_v13 = vpop.permute.xlu1 %1858 }
  0xdf   : > { %v981_v15 = vsel %vm979_vm14, %v976_v9, %v978_v62  ;;  %2196 = vmatmul.mubr.msk.f32.vlgmr.msra.gmra.mrb[12].mxu1 %vm316_vm6, %v273_v59  ;;  %v1864_v21 = vsel %vm979_vm14, %v1859_v13, %v1861_v3 }
  0xe0   : > { %2170 = vmatprep.subr.msk.mxu0 %vm320_vm4, %v981_v15  ;;  %1940 = vmatprep.mubr.f32.mxu1 %v2326_v10 }
  0xe2   : > { %v974_v37 = vpop.permute.xlu0 %973  ;;  %v1960_v40 = vpop.permute.xlu1 %1959 }
  0xe3   : > { %v980_v17 = vsel %vm979_vm14, %v974_v37, %v976_v9 }
  0xe4   : > { %2171 = vmatpush1.msk.msra.mxu0 %vm320_vm4, %v980_v17 }
  0xe5   : > { %2172 = vmatmul.mubr.msk.f32.vlgmr.msra.gmra.mrb[0].mxu0 %vm316_vm6, %v986_v18 }
  0xe6   : > { %v1863_v19 = vpop.permute.xlu0 %1862  ;;  %1154 = vmatprep.mubr.f32.mxu0 %v2326_v10  ;;  %v1071_v22 = vpop.permute.xlu1 %1070 }
  0xe7   : > { %v1865_v20 = vsel %vm979_vm14, %v1861_v3, %v1863_v19 }
  0xe8   : > { %2197 = vmatprep.subr.msk.mxu1 %vm320_vm4, %v1865_v20 }
  0xe9   : > { %2198 = vmatpush1.msk.msra.mxu1 %vm320_vm4, %v1864_v21 }
  0xea   : > { %v1958_v23 = vpop.permute.xlu0 %1957  ;;  %2199 = vmatmul.mubr.msk.f32.vlgmr.msra.gmra.mrb[14].mxu1 %vm316_vm6, %v986_v18  ;;  %v1069_v27 = vpop.permute.xlu1 %1068 }
  0xeb   : > { %v1962_v24 = vsel %vm1074_vm15, %v1958_v23, %v1960_v40  ;;  %2037 = vmatprep.mubr.f32.mxu1 %v2326_v10  ;;  %v1075_v11 = vsel %vm1074_vm15, %v1069_v27, %v1071_v22 }
  0xec   : > { %v1966_v12 = vsel %vm267_vm9, %v1962_v24, 0.0  ;;  %v1079_v32 = vsel %vm266_vm10, %v1075_v11, 0.0 }
  0xed   : > { %2200 = vmatprep.subr.msk.mxu1 %vm320_vm4, %v1966_v12 }
  0xee   : > { %v1956_v25 = vpop.permute.xlu0 %1955 }
  0xef   : > { %v1961_v26 = vsel %vm1074_vm15, %v1956_v25, %v1958_v23 }
  0xf0   : > { %v1965_v29 = vsel %vm266_vm10, %v1961_v26, 0.0 }
  0xf1   : > { %2201 = vmatpush1.msk.msra.mxu1 %vm320_vm4, %v1965_v29 }
  0xf2   : > { %v1073_v30 = vpop.permute.xlu0 %1072  ;;  %2202 = vmatmul.mubr.msk.f32.vlgmr.msra.gmra.mrb[16].mxu1 %vm316_vm6, %v274_v28 }
  0xf3   : > { %v1076_v10 = vsel %vm1074_vm15, %v1071_v22, %v1073_v30 }
  0xf4   : > { %v1080_v31 = vsel %vm267_vm9, %v1076_v10, 0.0 }
  0xf5   : > { %2173 = vmatprep.subr.msk.mxu0 %vm320_vm4, %v1080_v31 }
  0xf6   : > { %2174 = vmatpush1.msk.msra.mxu0 %vm320_vm4, %v1079_v32 }
  0xf7   : > { %2175 = vmatmul.mubr.msk.f32.vlgmr.msra.gmra.mrb[0].mxu0 %vm316_vm6, %v274_v28 }
 0x103   : > { %v289_v33 = vpop.permute.xlu0 %288 }
 0x104   : > { %v1165_v34 = vrot.slane %v289_v33, 4  ;;  %v291_v11 = vadd.f32 %v289_v33, %v2390_v4  ;;  %v292_v10 = vadd.f32 %v289_v33, %v2392_v5 }
 0x106   : > { %v1167_v35 = vadd.f32 %v1165_v34, %v2390_v4  ;;  %v1168_v36 = vadd.f32 %v1165_v34, %v2392_v5 }
 0x189   : > { %v1262_v38 = vpop.f32.mrb[0].mxu1 }
 0x18a   : > { %v1269_v39 = vrot.slane %v1262_v38, 4  ;;  %v1264_v41 = vpop.f32.mrb[1].mxu1 }
 0x18b   : > { %v1270_v48 = vrot.slane %v1264_v41, 4 }
 0x18c   : > { %v1273_v42 = vadd.f32 %v1269_v39, %v1167_v35 }
 0x18d   : > { %v1274_v43 = vadd.f32 %v1270_v48, %v1168_v36  ;;  %v1359_v53 = vpop.f32.mrb[2].mxu1 }
 0x18e   : > { %v1366_v44 = vrot.slane %v1359_v53, 4  ;;  %v1361_v45 = vpop.f32.mrb[3].mxu1 }
 0x18f   : > { %v1367_v46 = vrot.slane %v1361_v45, 4 }
 0x190   : > { %v1370_v47 = vadd.f32 %v1366_v44, %v1273_v42 }
 0x191   : > { %v1371_v49 = vadd.f32 %v1367_v46, %v1274_v43 }
 0x195   : > { %v1456_v50 = vpop.f32.mrb[4].mxu1 }
 0x196   : > { %v1463_v51 = vrot.slane %v1456_v50, 4  ;;  %v1458_v52 = vpop.f32.mrb[5].mxu1 }
 0x197   : > { %v1464_v54 = vrot.slane %v1458_v52, 4 }
 0x198   : > { %v1467_v55 = vadd.f32 %v1463_v51, %v1370_v47 }
 0x199   : > { %v1468_v56 = vadd.f32 %v1464_v54, %v1371_v49 }
 0x1a1   : > { %v1553_v57 = vpop.f32.mrb[6].mxu1 }
 0x1a2   : > { %v1560_v58 = vrot.slane %v1553_v57, 4  ;;  %v1555_v14 = vpop.f32.mrb[7].mxu1 }
 0x1a3   : > { %v1561_v59 = vrot.slane %v1555_v14, 4 }
 0x1a4   : > { %v1564_v16 = vadd.f32 %v1560_v58, %v1467_v55 }
 0x1a5   : > { %v1565_v60 = vadd.f32 %v1561_v59, %v1468_v56  ;;  %v1642_v61 = vpop.f32.mrb[8].mxu1 }
 0x1a6   : > { %v1649_v62 = vrot.slane %v1642_v61, 4  ;;  %v1644_v63 = vpop.f32.mrb[9].mxu1 }
 0x1a7   : > { %v1650_v0 = vrot.slane %v1644_v63, 4 }
 0x1a8   : > { %v1653_v1 = vadd.f32 %v1649_v62, %v1564_v16 }
 0x1a9   : > { %v1654_v2 = vadd.f32 %v1650_v0, %v1565_v60 }
 0x1ad   : > { %v1748_v3 = vpop.f32.mrb[10].mxu1 }
 0x1ae   : > { %v1755_v6 = vrot.slane %v1748_v3, 4  ;;  %v1750_v7 = vpop.f32.mrb[11].mxu1 }
 0x1af   : > { %v1756_v8 = vrot.slane %v1750_v7, 4 }
 0x1b0   : > { %v1759_v9 = vadd.f32 %v1755_v6, %v1653_v1 }
 0x1b1   : > { %v1760_v13 = vadd.f32 %v1756_v8, %v1654_v2 }
 0x1b2   : > { %v1845_v15 = vpop.f32.mrb[12].mxu1 }
 0x1b3   : > { %v1852_v37 = vrot.slane %v1845_v15, 4  ;;  %v1847_v17 = vpop.f32.mrb[13].mxu1 }
 0x1b4   : > { %v1853_v18 = vrot.slane %v1847_v17, 4 }
 0x1b5   : > { %v1856_v40 = vadd.f32 %v1852_v37, %v1759_v9 }
 0x1b6   : > { %v1857_v19 = vadd.f32 %v1853_v18, %v1760_v13 }
 0x1bd   : > { %v1942_v20 = vpop.f32.mrb[14].mxu1 }
 0x1be   : > { %v1949_v21 = vrot.slane %v1942_v20, 4  ;;  %v1944_v22 = vpop.f32.mrb[15].mxu1 }
 0x1bf   : > { %v1950_v23 = vrot.slane %v1944_v22, 4 }
 0x1c0   : > { %v1953_v24 = vadd.f32 %v1949_v21, %v1856_v40 }
 0x1c1   : > { %v1954_v12 = vadd.f32 %v1950_v23, %v1857_v19 }
 0x1c5   : > { %v2039_v25 = vpop.f32.mrb[16].mxu1 }
 0x1c6   : > { %v2046_v26 = vrot.slane %v2039_v25, 4  ;;  %v2041_v27 = vpop.f32.mrb[17].mxu1 }
 0x1c7   : > { %v2047_v28 = vrot.slane %v2041_v27, 4 }
 0x1c8   : > { %v2050_v29 = vadd.f32 %v2046_v26, %v1953_v24 }
 0x1c9   : > { %v2051_v30 = vadd.f32 %v2047_v28, %v1954_v12 }
 0x1ca   : > { %2052 = vst [vmem:[#allocation3] sm:$0xf0] %v2050_v29  ;;  %v1156_v31 = vpop.f32.mrb[0].mxu0 }
 0x1cb   : > { %2053 = vst [vmem:[#allocation3 + $0x8] sm:$0xf0] %v2051_v30  ;;  %v2207_v32 = vadd.f32 %v1156_v31, %v291_v11  ;;  %v1158_v34 = vpop.f32.mrb[1].mxu0 }
 0x1cc   : > { %v2208_v35 = vadd.f32 %v1158_v34, %v292_v10 }
 0x1cd   : > { %1163 = vst [vmem:[#allocation3] sm:$0xf] %v2207_v32 }
 0x1ce   : > { %1164 = vst [vmem:[#allocation3 + $0x8] sm:$0xf] %v2208_v35 }
 0x1cf   : > { %2282 = shalt.err (!%p2279_p13)
}
 0x1d0   : > { %s2283_s20 = scalar_lea.hbm %s2675_s3, 256 }
 0x1d1   : > { %p2284_p0 = scmp.ne.s32.totalorder %s2675_s3, %s2283_s20  ;;  %p2289_p3 = scmp.lt.u32.totalorder %s2283_s20, %s2675_s3 }
 0x1d3   : > { %p2285_p1 = pnand %p2284_p0, %p2637_p6 }
 0x1d5   : > { %p2286_p2 = pneg %p2285_p1 }
 0x1d7   : > { %p2291_p4 = pnand %p2289_p3, %p2286_p2 }
 0x1d9   : > { %2294 = shalt.err (!%p2291_p4)
}
 0x1da   : > { %2227 = dma.vmem_to_hbm [thread:$0]  (%p2637_p6), %s2065_s12, 256, %s2675_s3, [#allocation4]  }
 0x1db   : > { %2308 = dma.done.wait (%p2637_p6), [#allocation4], 256  }
 0x1dc   : > { %2310 = vsyncadd (%p2637_p6), [#allocation4], 4294967040 }
 0x1dd PF: > { %s14_s14 = sadd.s32 1, %s2321_s14   ;;  %s2677_s12 = smov %s2317_s13 }
 0x1de   : > { %p11_p5 = scmp.ge.s32.totalorder %s14_s14, 4   ;;  %s2678_s13 = smov %s2680_s16 }
 0x1e0   :  { %13 = sbr.rel (!%p11_p5) target bundleno = 2 (0x2), region = 70 }
 0x1e7   :  { %2077 = vsyncpa [#allocation4], 1 }
 0x1e8   :  { %2079 = vsyncpa [#allocation4 + $0x1], 1 }

</bundles_post_ra>
